<compile_context>
chip_gen: v7x
topology: tpu7x:2x2x1
jax: 0.10.0
libtpu: 0.0.40
codegen_flags: <defaults>
</compile_context>

<pallas_src>
import functools

import jax
import jax.numpy as jnp
from jax import lax
from jax.experimental import pallas as pl
from jax.experimental.pallas import tpu as pltpu

ENC_CH = (3, 8, 16)      # synthetic encoder.out_channels; last one feeds the wrapper extras
DEC_CH = 8
N_CLASSES = 1
BN_EPS = 1e-5


# ---------------------------------------------------------------------------
# Fused Pallas kernel: BlurPool + DPFFB + SE + bridge on (B, C, HW) NCHW data.
# Channels on sublanes, flattened spatial (HW) on lanes.
# ---------------------------------------------------------------------------
def _fused_post_encoder_kernel(x_ref, mask_ref, wbr_ref, bbr_ref, w1_ref,
                               w2_ref, wb_ref, bb_ref, o_ref, *, W):
    B, C, HW = x_ref.shape
    masks = mask_ref[...]                    # (4, HW) f32, precomputed at trace time
    m_l, m_r = masks[0:1], masks[1:2]        # left/right neighbor exists in same row
    m_u, m_d = masks[2:3], masks[3:4]        # up/down neighbor exists in same image
    wbr = wbr_ref[...]                       # (2C, C)  DPFFB (both branches, BN folded)
    bbr = bbr_ref[...]                       # (2C, 1)
    w1, w2 = w1_ref[...], w2_ref[...]        # (Cr, 2C), (2C, Cr)
    wbT = wb_ref[...]                        # (2C, C)  bridge weight, contraction dim first
    bb = bb_ref[...]                         # (C, 1)
    inv_hw = 1.0 / HW

    # Single grid step covers the whole batch; B is tiny and static, so a short
    # unrolled loop is fine and keeps every op 2-D (C x HW).
    for b in range(B):
        x = x_ref[b]                                     # (C, HW) f32

        # ---- separable 3x3 blur ([1,2,1]/4 twice), zero padding via masked
        # XLU lane-rolls (non-negative shifts, jnp.roll semantics) ----
        left = pltpu.roll(x, 1, axis=1)                  # x[:, i-1]
        right = pltpu.roll(x, HW - 1, axis=1)            # x[:, i+1]
        h = m_l * left + 2.0 * x + m_r * right           # (C, HW)
        up = pltpu.roll(h, W, axis=1)                    # h[:, i-W]
        down = pltpu.roll(h, HW - W, axis=1)             # h[:, i+W]
        blur = (m_u * up + 2.0 * h + m_d * down) * (1.0 / 16.0)

        # ---- DPFFB: both (1x1 conv no-bias + BN + ReLU) branches as ONE matmul ----
        y = jnp.dot(wbr, blur, preferred_element_type=jnp.float32)   # (2C, HW)
        y = jnp.maximum(y + bbr, 0.0)                    # bias = per-sublane broadcast

        # ---- SE: global avg pool (lane reduce) -> 1x1 -> ReLU -> 1x1 -> sigmoid ----
        pool = jnp.sum(y, axis=1, keepdims=True) * inv_hw                    # (2C, 1)
        z = jnp.maximum(
            jnp.dot(w1, pool, preferred_element_type=jnp.float32), 0.0)      # (Cr, 1)
        gate = jax.nn.sigmoid(
            jnp.dot(w2, z, preferred_element_type=jnp.float32))              # (2C, 1)

        # ---- bridge 1x1 conv with the SE gate folded into the weight:
        #      (y*g) @ Wb == y @ (diag(g) Wb)  -> scale the small weight only ----
        wg = wbT * gate                                   # (2C, C) per-sublane scale
        out = lax.dot_general(wg, y, (((0,), (0,)), ((), ())),
                              preferred_element_type=jnp.float32)     # (C, HW)
        o_ref[b] = (out + bb).astype(o_ref.dtype)


def fused_post_encoder(x_chw, masks, weights, *, W):
    """x_chw: (B, C, H*W) NCHW-flattened last encoder feature -> (B, C, H*W)."""
    B, C, HW = x_chw.shape
    C2 = weights[0].shape[0]            # 2C
    Cr = weights[2].shape[0]            # SE reduced channels

    def rep_spec(a):                    # small replicated weight/mask block
        zeros = (0,) * a.ndim
        return pl.BlockSpec(a.shape, lambda i, _z=zeros: _z)

    flops = int(B * (2 * HW * C * C2            # fused DPFFB matmul
                     + 2 * HW * C2 * C          # bridge matmul
                     + 2 * C2 * Cr + 2 * Cr * C2  # SE matmuls
                     + C2 * C                   # gate -> weight scale
                     + 10 * HW * C))            # blur taps
    wbytes = sum(int(w.size) * 4 for w in weights) + int(masks.size) * 4
    cost = pl.CostEstimate(flops=flops,
                           transcendentals=int(B * C2),
                           bytes_accessed=int(8 * B * HW * C + wbytes))

    return pl.pallas_call(
        functools.partial(_fused_post_encoder_kernel, W=W),
        out_shape=jax.ShapeDtypeStruct((B, C, HW), x_chw.dtype),
        grid=(1,),                      # one step: whole batch in one block
        in_specs=[pl.BlockSpec((B, C, HW), lambda i: (0, 0, 0)),
                  rep_spec(masks)] + [rep_spec(w) for w in weights],
        out_specs=pl.BlockSpec((B, C, HW), lambda i: (0, 0, 0)),
        compiler_params=pltpu.CompilerParams(
            dimension_semantics=("arbitrary",)),
        cost_estimate=cost,
    )(x_chw, masks, *weights)


# ---------------------------------------------------------------------------
# Plain-JAX glue: synthetic base model.
# TODO(synk): the real UNet++ encoder/decoder/segmentation_head live in the
# external `base_model` (segmentation_models_pytorch); replaced by a minimal
# deterministic stand-in so the wrapper's post-encoder Pallas hot path runs
# end-to-end with the same interface (features list, last-feature swap).
# ---------------------------------------------------------------------------
def _conv2d(x, w, b=None, stride=1, padding="SAME"):
    y = jax.lax.conv_general_dilated(
        x, w, window_strides=(stride, stride), padding=padding,
        dimension_numbers=("NCHW", "OIHW", "NCHW"))
    if b is not None:
        y = y + b[None, :, None, None]
    return y


def _upsample2(x):  # nearest-neighbor x2, NCHW
    return jnp.repeat(jnp.repeat(x, 2, axis=2), 2, axis=3)


def synthetic_encoder(x, p):
    f0 = x
    f1 = jax.nn.relu(_conv2d(x, p["enc1_w"], p["enc1_b"], stride=2))
    f2 = jax.nn.relu(_conv2d(f1, p["enc2_w"], p["enc2_b"], stride=2))
    return [f0, f1, f2]


def synthetic_decoder(feats, p):
    f0, f1, f2 = feats
    d1 = jax.nn.relu(_conv2d(jnp.concatenate([_upsample2(f2), f1], axis=1),
                             p["dec1_w"], p["dec1_b"]))
    d0 = jax.nn.relu(_conv2d(jnp.concatenate([_upsample2(d1), f0], axis=1),
                             p["dec0_w"], p["dec0_b"]))
    return d0


def segmentation_head(x, p):
    return _conv2d(x, p["head_w"], p["head_b"])


def init_params(key):
    C = ENC_CH[-1]
    C2 = 2 * C
    Cr = C2 // 2
    ks = jax.random.split(key, 15)
    n = lambda k, shape, s=0.1: (s * jax.random.normal(k, shape)).astype(jnp.float32)
    return {
        # synthetic base encoder / decoder / head
        "enc1_w": n(ks[0], (ENC_CH[1], ENC_CH[0], 3, 3)),
        "enc1_b": jnp.zeros((ENC_CH[1],), jnp.float32),
        "enc2_w": n(ks[1], (ENC_CH[2], ENC_CH[1], 3, 3)),
        "enc2_b": jnp.zeros((ENC_CH[2],), jnp.float32),
        "dec1_w": n(ks[2], (DEC_CH, ENC_CH[2] + ENC_CH[1], 1, 1)),
        "dec1_b": jnp.zeros((DEC_CH,), jnp.float32),
        "dec0_w": n(ks[3], (DEC_CH, DEC_CH + ENC_CH[0], 1, 1)),
        "dec0_b": jnp.zeros((DEC_CH,), jnp.float32),
        "head_w": n(ks[4], (N_CLASSES, DEC_CH, 3, 3)),
        "head_b": jnp.zeros((N_CLASSES,), jnp.float32),
        # DPFFB: two (1x1 conv no-bias + BN + ReLU) branches, with BN running stats
        "dpffb_wu": n(ks[5], (C, C)),
        "dpffb_gu": (1.0 + 0.1 * jax.random.normal(ks[6], (C,))).astype(jnp.float32),
        "dpffb_bu": n(ks[7], (C,)),
        "dpffb_rm_u": jnp.zeros((C,), jnp.float32),
        "dpffb_rv_u": jnp.ones((C,), jnp.float32),
        "dpffb_wl": n(ks[8], (C, C)),
        "dpffb_gl": (1.0 + 0.1 * jax.random.normal(ks[9], (C,))).astype(jnp.float32),
        "dpffb_bl": n(ks[10], (C,)),
        "dpffb_rm_l": jnp.zeros((C,), jnp.float32),
        "dpffb_rv_l": jnp.ones((C,), jnp.float32),
        # SE block (reduction=2), 1x1 convs without bias
        "se_w1": n(ks[11], (Cr, C2)),
        "se_w2": n(ks[12], (C2, Cr)),
        # bridge: 1x1 conv, 2C -> C, with bias
        "bridge_w": n(ks[13], (C, C2)),
        "bridge_b": n(ks[14], (C,)),
    }


def hc_unetpp_forward(x, p):
    feats = synthetic_encoder(x, p)
    f = feats[-1]                                       # (B, C, H, W) NCHW
    B, C, H, W = f.shape
    HW = H * W

    # Fold eval-mode BatchNorm into the 1x1 conv weights (trace-time, free):
    #   scale = gamma / sqrt(running_var + eps); bias = beta - scale * running_mean
    su = p["dpffb_gu"] / jnp.sqrt(p["dpffb_rv_u"] + BN_EPS)
    sl = p["dpffb_gl"] / jnp.sqrt(p["dpffb_rv_l"] + BN_EPS)
    bu = p["dpffb_bu"] - su * p["dpffb_rm_u"]
    bl = p["dpffb_bl"] - sl * p["dpffb_rm_l"]
    # Both DPFFB branches in one (2C, C) weight / (2C, 1) bias; row order
    # [upper ; lower] matches torch.cat([upper, lower], dim=1), so se_w1 /
    # se_w2 / bridge_w channel ordering stays consistent.
    w_branch = jnp.concatenate([su[:, None] * p["dpffb_wu"],
                                sl[:, None] * p["dpffb_wl"]], axis=0)
    b_branch = jnp.concatenate([bu, bl])[:, None]

    weights = (
        w_branch, b_branch,
        p["se_w1"], p["se_w2"],
        p["bridge_w"].T,                 # (2C, C): contraction dim first in-kernel
        p["bridge_b"][:, None],          # (C, 1)
    )

    # Blur boundary masks, computed once at trace time (no per-step iota/%).
    idx = jnp.arange(HW, dtype=jnp.int32)
    col = idx % W
    masks = jnp.stack([(col != 0), (col != W - 1),
                       (idx >= W), (idx < HW - W)]).astype(jnp.float32)  # (4, HW)

    # ---- single fused Pallas kernel, consuming NCHW directly as (B, C, HW) ----
    y = fused_post_encoder(f.reshape(B, C, HW), masks, weights, W=W)
    feats[-1] = y.reshape(B, C, H, W)

    dec = synthetic_decoder(feats, p)
    return segmentation_head(dec, p)


if __name__ == "__main__":
    key = jax.random.PRNGKey(0)
    kx, kp = jax.random.split(key)
    # NCHW like PyTorch; 64x64 input -> last encoder feature 16x16 (HW=256,
    # a lane-dense multiple of 128 for the fused kernel).
    x = jax.random.normal(kx, (2, 3, 64, 64), jnp.float32)
    params = init_params(kp)

    out = jax.jit(hc_unetpp_forward)(x, params)
    jax.block_until_ready(out)
    assert out.shape == (2, N_CLASSES, 64, 64), out.shape
    print("KERNEL_OK")
</pallas_src>

<mosaic_0001>
module attributes {stable_mosaic.version = 11 : i64} {
  func.func @_fused_post_encoder_kernel(%arg0: i32, %arg1: memref<2x16x256xf32, #tpu.memory_space<vmem>>, %arg2: memref<4x256xf32, #tpu.memory_space<vmem>>, %arg3: memref<32x16xf32, #tpu.memory_space<vmem>>, %arg4: memref<32x1xf32, #tpu.memory_space<vmem>>, %arg5: memref<16x32xf32, #tpu.memory_space<vmem>>, %arg6: memref<32x16xf32, #tpu.memory_space<vmem>>, %arg7: memref<32x16xf32, #tpu.memory_space<vmem>>, %arg8: memref<16x1xf32, #tpu.memory_space<vmem>>, %arg9: memref<2x16x256xf32, #tpu.memory_space<vmem>>) attributes {dimension_semantics = [#tpu.dimension_semantics<arbitrary>], iteration_bounds = array<i64: 1>, scalar_prefetch = 0 : i64, scratch_operands = 0 : i64, tpu.core_type = #tpu.core_type<tc>, window_params = [{pipeline_mode = #tpu.pipeline_mode<synchronous>, transform_indices = @transform_0, window_bounds = array<i64: 2, 16, 256>}, {pipeline_mode = #tpu.pipeline_mode<synchronous>, transform_indices = @transform_1, window_bounds = array<i64: 4, 256>}, {pipeline_mode = #tpu.pipeline_mode<synchronous>, transform_indices = @transform_2, window_bounds = array<i64: 32, 16>}, {pipeline_mode = #tpu.pipeline_mode<synchronous>, transform_indices = @transform_3, window_bounds = array<i64: 32, 1>}, {pipeline_mode = #tpu.pipeline_mode<synchronous>, transform_indices = @transform_4, window_bounds = array<i64: 16, 32>}, {pipeline_mode = #tpu.pipeline_mode<synchronous>, transform_indices = @transform_5, window_bounds = array<i64: 32, 16>}, {pipeline_mode = #tpu.pipeline_mode<synchronous>, transform_indices = @transform_6, window_bounds = array<i64: 32, 16>}, {pipeline_mode = #tpu.pipeline_mode<synchronous>, transform_indices = @transform_7, window_bounds = array<i64: 16, 1>}, {pipeline_mode = #tpu.pipeline_mode<synchronous>, transform_indices = @transform_8, window_bounds = array<i64: 2, 16, 256>}]} {
    %c0 = arith.constant 0 : index
    %c0_0 = arith.constant 0 : index
    %0 = vector.load %arg2[%c0, %c0_0] : memref<4x256xf32, #tpu.memory_space<vmem>>, vector<4x256xf32>
    %1 = vector.extract_strided_slice %0 {offsets = [0, 0], sizes = [1, 256], strides = [1, 1]} : vector<4x256xf32> to vector<1x256xf32>
    %2 = vector.extract_strided_slice %0 {offsets = [1, 0], sizes = [1, 256], strides = [1, 1]} : vector<4x256xf32> to vector<1x256xf32>
    %3 = vector.extract_strided_slice %0 {offsets = [2, 0], sizes = [1, 256], strides = [1, 1]} : vector<4x256xf32> to vector<1x256xf32>
    %4 = vector.extract_strided_slice %0 {offsets = [3, 0], sizes = [1, 256], strides = [1, 1]} : vector<4x256xf32> to vector<1x256xf32>
    %c0_1 = arith.constant 0 : index
    %c0_2 = arith.constant 0 : index
    %5 = vector.load %arg3[%c0_1, %c0_2] : memref<32x16xf32, #tpu.memory_space<vmem>>, vector<32x16xf32>
    %c0_3 = arith.constant 0 : index
    %c0_4 = arith.constant 0 : index
    %6 = vector.load %arg4[%c0_3, %c0_4] : memref<32x1xf32, #tpu.memory_space<vmem>>, vector<32x1xf32>
    %c0_5 = arith.constant 0 : index
    %c0_6 = arith.constant 0 : index
    %7 = vector.load %arg5[%c0_5, %c0_6] : memref<16x32xf32, #tpu.memory_space<vmem>>, vector<16x32xf32>
    %c0_7 = arith.constant 0 : index
    %c0_8 = arith.constant 0 : index
    %8 = vector.load %arg6[%c0_7, %c0_8] : memref<32x16xf32, #tpu.memory_space<vmem>>, vector<32x16xf32>
    %c0_9 = arith.constant 0 : index
    %c0_10 = arith.constant 0 : index
    %9 = vector.load %arg7[%c0_9, %c0_10] : memref<32x16xf32, #tpu.memory_space<vmem>>, vector<32x16xf32>
    %c0_11 = arith.constant 0 : index
    %c0_12 = arith.constant 0 : index
    %10 = vector.load %arg8[%c0_11, %c0_12] : memref<16x1xf32, #tpu.memory_space<vmem>>, vector<16x1xf32>
    %c0_13 = arith.constant 0 : index
    %c0_14 = arith.constant 0 : index
    %c0_15 = arith.constant 0 : index
    %11 = vector.load %arg1[%c0_13, %c0_14, %c0_15] : memref<2x16x256xf32, #tpu.memory_space<vmem>>, vector<1x16x256xf32>
    %12 = vector.shape_cast %11 : vector<1x16x256xf32> to vector<16x256xf32>
    %c1_i32 = arith.constant 1 : i32
    %13 = tpu.dynamic_rotate %12 by %c1_i32 dim 1 : vector<16x256xf32>, i32 -> vector<16x256xf32>
    %c255_i32 = arith.constant 255 : i32
    %14 = tpu.dynamic_rotate %12 by %c255_i32 dim 1 : vector<16x256xf32>, i32 -> vector<16x256xf32>
    %15 = vector.broadcast %1 : vector<1x256xf32> to vector<16x256xf32>
    %16 = arith.mulf %15, %13 : vector<16x256xf32>
    %cst = arith.constant 2.000000e+00 : f32
    %17 = vector.broadcast %cst : f32 to vector<16x256xf32>
    %18 = arith.mulf %17, %12 : vector<16x256xf32>
    %19 = arith.addf %16, %18 : vector<16x256xf32>
    %20 = vector.broadcast %2 : vector<1x256xf32> to vector<16x256xf32>
    %21 = arith.mulf %20, %14 : vector<16x256xf32>
    %22 = arith.addf %19, %21 : vector<16x256xf32>
    %c16_i32 = arith.constant 16 : i32
    %23 = tpu.dynamic_rotate %22 by %c16_i32 dim 1 : vector<16x256xf32>, i32 -> vector<16x256xf32>
    %c240_i32 = arith.constant 240 : i32
    %24 = tpu.dynamic_rotate %22 by %c240_i32 dim 1 : vector<16x256xf32>, i32 -> vector<16x256xf32>
    %25 = vector.broadcast %3 : vector<1x256xf32> to vector<16x256xf32>
    %26 = arith.mulf %25, %23 : vector<16x256xf32>
    %cst_16 = arith.constant 2.000000e+00 : f32
    %27 = vector.broadcast %cst_16 : f32 to vector<16x256xf32>
    %28 = arith.mulf %27, %22 : vector<16x256xf32>
    %29 = arith.addf %26, %28 : vector<16x256xf32>
    %30 = vector.broadcast %4 : vector<1x256xf32> to vector<16x256xf32>
    %31 = arith.mulf %30, %24 : vector<16x256xf32>
    %32 = arith.addf %29, %31 : vector<16x256xf32>
    %cst_17 = arith.constant 6.250000e-02 : f32
    %33 = vector.broadcast %cst_17 : f32 to vector<16x256xf32>
    %34 = arith.mulf %32, %33 : vector<16x256xf32>
    %cst_18 = arith.constant dense<0.000000e+00> : vector<32x256xf32>
    %35 = tpu.matmul %5, %34, %cst_18 {dimension_numbers = #tpu.dot_dimension_numbers<[1], [0], [0], [1], [0, 0, 1, 1], [], []>} : vector<32x16xf32>, vector<16x256xf32>, vector<32x256xf32> -> vector<32x256xf32>
    %36 = vector.broadcast %6 : vector<32x1xf32> to vector<32x256xf32>
    %37 = arith.addf %35, %36 : vector<32x256xf32>
    %cst_19 = arith.constant 0.000000e+00 : f32
    %38 = vector.broadcast %cst_19 : f32 to vector<32x256xf32>
    %39 = arith.maximumf %37, %38 : vector<32x256xf32>
    %cst_20 = arith.constant dense<0.000000e+00> : vector<32xf32>
    %40 = vector.multi_reduction <add>, %39, %cst_20 [1] : vector<32x256xf32> to vector<32xf32>
    %41 = vector.shape_cast %40 : vector<32xf32> to vector<32x1xf32>
    %cst_21 = arith.constant 3.906250e-03 : f32
    %42 = vector.broadcast %cst_21 : f32 to vector<32x1xf32>
    %43 = arith.mulf %41, %42 : vector<32x1xf32>
    %cst_22 = arith.constant dense<0.000000e+00> : vector<16x1xf32>
    %44 = tpu.matmul %7, %43, %cst_22 {dimension_numbers = #tpu.dot_dimension_numbers<[1], [0], [0], [1], [0, 0, 1, 1], [], []>} : vector<16x32xf32>, vector<32x1xf32>, vector<16x1xf32> -> vector<16x1xf32>
    %cst_23 = arith.constant 0.000000e+00 : f32
    %45 = vector.broadcast %cst_23 : f32 to vector<16x1xf32>
    %46 = arith.maximumf %44, %45 : vector<16x1xf32>
    %cst_24 = arith.constant dense<0.000000e+00> : vector<32x1xf32>
    %47 = tpu.matmul %8, %46, %cst_24 {dimension_numbers = #tpu.dot_dimension_numbers<[1], [0], [0], [1], [0, 0, 1, 1], [], []>} : vector<32x16xf32>, vector<16x1xf32>, vector<32x1xf32> -> vector<32x1xf32>
    %48 = arith.negf %47 : vector<32x1xf32>
    %49 = math.exp %48 : vector<32x1xf32>
    %cst_25 = arith.constant 1.000000e+00 : f32
    %50 = vector.broadcast %cst_25 : f32 to vector<32x1xf32>
    %51 = arith.addf %50, %49 : vector<32x1xf32>
    %52 = arith.divf %50, %51 : vector<32x1xf32>
    %53 = vector.broadcast %52 : vector<32x1xf32> to vector<32x16xf32>
    %54 = arith.mulf %9, %53 : vector<32x16xf32>
    %cst_26 = arith.constant dense<0.000000e+00> : vector<16x256xf32>
    %55 = tpu.matmul %54, %39, %cst_26 {dimension_numbers = #tpu.dot_dimension_numbers<[0], [0], [1], [1], [0, 1, 1, 1], [], []>} : vector<32x16xf32>, vector<32x256xf32>, vector<16x256xf32> -> vector<16x256xf32>
    %56 = vector.broadcast %10 : vector<16x1xf32> to vector<16x256xf32>
    %57 = arith.addf %55, %56 : vector<16x256xf32>
    %c0_27 = arith.constant 0 : index
    %c0_28 = arith.constant 0 : index
    %c0_29 = arith.constant 0 : index
    %58 = vector.load %arg9[%c0_27, %c0_28, %c0_29] : memref<2x16x256xf32, #tpu.memory_space<vmem>>, vector<1x16x256xf32>
    %59 = vector.shape_cast %58 : vector<1x16x256xf32> to vector<16x256xf32>
    %60 = vector.shape_cast %57 : vector<16x256xf32> to vector<1x16x256xf32>
    tpu.vector_store %arg9[%c0_27, %c0_28, %c0_29], %60 {strides = array<i32>} : memref<2x16x256xf32, #tpu.memory_space<vmem>>, vector<1x16x256xf32>,
    %c1 = arith.constant 1 : index
    %c0_30 = arith.constant 0 : index
    %c0_31 = arith.constant 0 : index
    %61 = vector.load %arg1[%c1, %c0_30, %c0_31] : memref<2x16x256xf32, #tpu.memory_space<vmem>>, vector<1x16x256xf32>
    %62 = vector.shape_cast %61 : vector<1x16x256xf32> to vector<16x256xf32>
    %c1_i32_32 = arith.constant 1 : i32
    %63 = tpu.dynamic_rotate %62 by %c1_i32_32 dim 1 : vector<16x256xf32>, i32 -> vector<16x256xf32>
    %c255_i32_33 = arith.constant 255 : i32
    %64 = tpu.dynamic_rotate %62 by %c255_i32_33 dim 1 : vector<16x256xf32>, i32 -> vector<16x256xf32>
    %65 = vector.broadcast %1 : vector<1x256xf32> to vector<16x256xf32>
    %66 = arith.mulf %65, %63 : vector<16x256xf32>
    %cst_34 = arith.constant 2.000000e+00 : f32
    %67 = vector.broadcast %cst_34 : f32 to vector<16x256xf32>
    %68 = arith.mulf %67, %62 : vector<16x256xf32>
    %69 = arith.addf %66, %68 : vector<16x256xf32>
    %70 = vector.broadcast %2 : vector<1x256xf32> to vector<16x256xf32>
    %71 = arith.mulf %70, %64 : vector<16x256xf32>
    %72 = arith.addf %69, %71 : vector<16x256xf32>
    %c16_i32_35 = arith.constant 16 : i32
    %73 = tpu.dynamic_rotate %72 by %c16_i32_35 dim 1 : vector<16x256xf32>, i32 -> vector<16x256xf32>
    %c240_i32_36 = arith.constant 240 : i32
    %74 = tpu.dynamic_rotate %72 by %c240_i32_36 dim 1 : vector<16x256xf32>, i32 -> vector<16x256xf32>
    %75 = vector.broadcast %3 : vector<1x256xf32> to vector<16x256xf32>
    %76 = arith.mulf %75, %73 : vector<16x256xf32>
    %cst_37 = arith.constant 2.000000e+00 : f32
    %77 = vector.broadcast %cst_37 : f32 to vector<16x256xf32>
    %78 = arith.mulf %77, %72 : vector<16x256xf32>
    %79 = arith.addf %76, %78 : vector<16x256xf32>
    %80 = vector.broadcast %4 : vector<1x256xf32> to vector<16x256xf32>
    %81 = arith.mulf %80, %74 : vector<16x256xf32>
    %82 = arith.addf %79, %81 : vector<16x256xf32>
    %cst_38 = arith.constant 6.250000e-02 : f32
    %83 = vector.broadcast %cst_38 : f32 to vector<16x256xf32>
    %84 = arith.mulf %82, %83 : vector<16x256xf32>
    %cst_39 = arith.constant dense<0.000000e+00> : vector<32x256xf32>
    %85 = tpu.matmul %5, %84, %cst_39 {dimension_numbers = #tpu.dot_dimension_numbers<[1], [0], [0], [1], [0, 0, 1, 1], [], []>} : vector<32x16xf32>, vector<16x256xf32>, vector<32x256xf32> -> vector<32x256xf32>
    %86 = vector.broadcast %6 : vector<32x1xf32> to vector<32x256xf32>
    %87 = arith.addf %85, %86 : vector<32x256xf32>
    %cst_40 = arith.constant 0.000000e+00 : f32
    %88 = vector.broadcast %cst_40 : f32 to vector<32x256xf32>
    %89 = arith.maximumf %87, %88 : vector<32x256xf32>
    %cst_41 = arith.constant dense<0.000000e+00> : vector<32xf32>
    %90 = vector.multi_reduction <add>, %89, %cst_41 [1] : vector<32x256xf32> to vector<32xf32>
    %91 = vector.shape_cast %90 : vector<32xf32> to vector<32x1xf32>
    %cst_42 = arith.constant 3.906250e-03 : f32
    %92 = vector.broadcast %cst_42 : f32 to vector<32x1xf32>
    %93 = arith.mulf %91, %92 : vector<32x1xf32>
    %cst_43 = arith.constant dense<0.000000e+00> : vector<16x1xf32>
    %94 = tpu.matmul %7, %93, %cst_43 {dimension_numbers = #tpu.dot_dimension_numbers<[1], [0], [0], [1], [0, 0, 1, 1], [], []>} : vector<16x32xf32>, vector<32x1xf32>, vector<16x1xf32> -> vector<16x1xf32>
    %cst_44 = arith.constant 0.000000e+00 : f32
    %95 = vector.broadcast %cst_44 : f32 to vector<16x1xf32>
    %96 = arith.maximumf %94, %95 : vector<16x1xf32>
    %cst_45 = arith.constant dense<0.000000e+00> : vector<32x1xf32>
    %97 = tpu.matmul %8, %96, %cst_45 {dimension_numbers = #tpu.dot_dimension_numbers<[1], [0], [0], [1], [0, 0, 1, 1], [], []>} : vector<32x16xf32>, vector<16x1xf32>, vector<32x1xf32> -> vector<32x1xf32>
    %98 = arith.negf %97 : vector<32x1xf32>
    %99 = math.exp %98 : vector<32x1xf32>
    %cst_46 = arith.constant 1.000000e+00 : f32
    %100 = vector.broadcast %cst_46 : f32 to vector<32x1xf32>
    %101 = arith.addf %100, %99 : vector<32x1xf32>
    %102 = arith.divf %100, %101 : vector<32x1xf32>
    %103 = vector.broadcast %102 : vector<32x1xf32> to vector<32x16xf32>
    %104 = arith.mulf %9, %103 : vector<32x16xf32>
    %cst_47 = arith.constant dense<0.000000e+00> : vector<16x256xf32>
    %105 = tpu.matmul %104, %89, %cst_47 {dimension_numbers = #tpu.dot_dimension_numbers<[0], [0], [1], [1], [0, 1, 1, 1], [], []>} : vector<32x16xf32>, vector<32x256xf32>, vector<16x256xf32> -> vector<16x256xf32>
    %106 = vector.broadcast %10 : vector<16x1xf32> to vector<16x256xf32>
    %107 = arith.addf %105, %106 : vector<16x256xf32>
    %c1_48 = arith.constant 1 : index
    %c0_49 = arith.constant 0 : index
    %c0_50 = arith.constant 0 : index
    %108 = vector.load %arg9[%c1_48, %c0_49, %c0_50] : memref<2x16x256xf32, #tpu.memory_space<vmem>>, vector<1x16x256xf32>
    %109 = vector.shape_cast %108 : vector<1x16x256xf32> to vector<16x256xf32>
    %110 = vector.shape_cast %107 : vector<16x256xf32> to vector<1x16x256xf32>
    tpu.vector_store %arg9[%c1_48, %c0_49, %c0_50], %110 {strides = array<i32>} : memref<2x16x256xf32, #tpu.memory_space<vmem>>, vector<1x16x256xf32>,
    return
  }
  func.func @transform_0(%arg0: i32) -> (i32, i32, i32) {
    %c0_i32 = arith.constant 0 : i32
    %c0_i32_0 = arith.constant 0 : i32
    %c0_i32_1 = arith.constant 0 : i32
    %c0_i32_2 = arith.constant 0 : i32
    return %c0_i32, %c0_i32_0, %c0_i32_1 : i32, i32, i32
  }
  func.func @transform_1(%arg0: i32) -> (i32, i32) {
    %c0_i32 = arith.constant 0 : i32
    %c0_i32_0 = arith.constant 0 : i32
    %c0_i32_1 = arith.constant 0 : i32
    return %c0_i32, %c0_i32_0 : i32, i32
  }
  func.func @transform_2(%arg0: i32) -> (i32, i32) {
    %c0_i32 = arith.constant 0 : i32
    %c0_i32_0 = arith.constant 0 : i32
    %c0_i32_1 = arith.constant 0 : i32
    return %c0_i32, %c0_i32_0 : i32, i32
  }
  func.func @transform_3(%arg0: i32) -> (i32, i32) {
    %c0_i32 = arith.constant 0 : i32
    %c0_i32_0 = arith.constant 0 : i32
    %c0_i32_1 = arith.constant 0 : i32
    return %c0_i32, %c0_i32_0 : i32, i32
  }
  func.func @transform_4(%arg0: i32) -> (i32, i32) {
    %c0_i32 = arith.constant 0 : i32
    %c0_i32_0 = arith.constant 0 : i32
    %c0_i32_1 = arith.constant 0 : i32
    return %c0_i32, %c0_i32_0 : i32, i32
  }
  func.func @transform_5(%arg0: i32) -> (i32, i32) {
    %c0_i32 = arith.constant 0 : i32
    %c0_i32_0 = arith.constant 0 : i32
    %c0_i32_1 = arith.constant 0 : i32
    return %c0_i32, %c0_i32_0 : i32, i32
  }
  func.func @transform_6(%arg0: i32) -> (i32, i32) {
    %c0_i32 = arith.constant 0 : i32
    %c0_i32_0 = arith.constant 0 : i32
    %c0_i32_1 = arith.constant 0 : i32
    return %c0_i32, %c0_i32_0 : i32, i32
  }
  func.func @transform_7(%arg0: i32) -> (i32, i32) {
    %c0_i32 = arith.constant 0 : i32
    %c0_i32_0 = arith.constant 0 : i32
    %c0_i32_1 = arith.constant 0 : i32
    return %c0_i32, %c0_i32_0 : i32, i32
  }
  func.func @transform_8(%arg0: i32) -> (i32, i32, i32) {
    %c0_i32 = arith.constant 0 : i32
    %c0_i32_0 = arith.constant 0 : i32
    %c0_i32_1 = arith.constant 0 : i32
    %c0_i32_2 = arith.constant 0 : i32
    return %c0_i32, %c0_i32_0, %c0_i32_1 : i32, i32, i32
  }
}

</mosaic_0001>

<bundles_post_ra>
// kernel: hc_unetpp_forward.1
= control target key start
LH: loop header
LB: loop body
LE: loop exit
PB: predicated region body
PF: predicated region fallthrough
CT: control target
= control target key end

     0   :  { %s1467_s9 = smov 1   ;;  %s1468_s14 = smov 127   ;;  %v62_v4 = vlaneseq  ;;  %v1471_v56 = vmov 0.0   ;;  %v1472_v57 = vmov 0   ;;  %vm245_vm4 = vcmask 130048   ;;  %s1927_s0 = inlined_call_operand.vmem [shape: f32[2,16,256], index: 0, kind: input, shape index: {}]   ;;  %s1928_s1 = inlined_call_operand.vmem [shape: f32[4,256], index: 1, kind: input, shape index: {}]   ;;  %s1929_s3 = inlined_call_operand.vmem [shape: f32[32,1], index: 3, kind: input, shape index: {}]   ;;  %s1930_s2 = inlined_call_operand.vmem [shape: f32[32,16], index: 2, kind: input, shape index: {}]   ;;  %s1931_s4 = inlined_call_operand.vmem [shape: f32[16,32], index: 4, kind: input, shape index: {}]   ;;  %s1932_s5 = inlined_call_operand.vmem [shape: f32[32,16], index: 5, kind: input, shape index: {}]   ;;  %s1933_s6 = inlined_call_operand.vmem [shape: f32[32,16], index: 6, kind: input, shape index: {}]   ;;  %s1934_s7 = inlined_call_operand.vmem [shape: f32[16,1], index: 7, kind: input, shape index: {}]   ;;  %s1935_s8 = inlined_call_operand.vmem [shape: f32[2,16,256], index: 8, kind: output, shape index: {}]  }
   0x1   :  { %v51_v0 = vld [vmem:[%s1927_s0 + $0x8] sm:$0xff]  ;;  %v50_v1 = vld [vmem:[%s1927_s0] sm:$0xff]  ;;  %v53_v2 = vld [vmem:[%s1927_s0 + $0x18] sm:$0xff]  ;;  %s1470_s17 = smov 112   ;;  %322 = vmatprep.mubr.f32.mxu0 %v1471_v56  ;;  %1433 = vset.pattern.permute.xlu0 %v1472_v57  ;;  %vm371_vm5 = vcmask 261120  }
   0x2   :  { %58 = vrot.lane.b32.xlu1 %v51_v0, %s1467_s9  ;;  %54 = vrot.lane.b32.xlu0 %v50_v1, %s1467_s9  ;;  %v52_v3 = vld [vmem:[%s1927_s0 + $0x10] sm:$0xff]  ;;  %v1538_v5 = vshrl.u32 %v62_v4, 7  ;;  %v1544_v7 = vld [vmem:[%s1928_s1] sm:$0xff]  ;;  %v1546_v8 = vand.u32 127, %v62_v4  ;;  %v105_v22 = vmul.f32 2.0, %v50_v1  ;;  %v106_v32 = vmul.f32 2.0, %v51_v0 }
   0x3   :  { %v107_v29 = vmul.f32 2.0, %v52_v3  ;;  %v108_v34 = vmul.f32 2.0, %v53_v2  ;;  %s1469_s1 = smov 16   ;;  %v34_v58 = vld [vmem:[%s1929_s3] sm:$0xff]  ;;  %1434 = vset.pattern.permute.xlu1 %v1472_v57  ;;  %v35_v59 = vld [vmem:[%s1929_s3 + $0x8] sm:$0xff]  ;;  %v36_v60 = vld [vmem:[%s1929_s3 + $0x10] sm:$0xff] }
   0x4   :  { %v85_v6 = vsub.s32 0, %v1538_v5  ;;  %v89_v11 = vsub.s32 4, %v1538_v5  ;;  %vm64_vm0 = vcmp.lt.s32.totalorder %v1546_v8, 1  ;;  %v115_v13 = vsub.s32 1, %v1538_v5  ;;  %v37_v61 = vld [vmem:[%s1929_s3 + $0x18] sm:$0xff] }
   0x5   :  { %v119_v18 = vsub.s32 5, %v1538_v5  ;;  %vm77_vm1 = vcmp.lt.s32.totalorder %v1546_v8, 127  ;;  %v167_v62 = vsub.s32 2, %v1538_v5  ;;  %v171_v63 = vsub.s32 6, %v1538_v5 }
   0x6   :  { %60 = vrot.lane.b32.xlu1 %v53_v2, %s1467_s9  ;;  %56 = vrot.lane.b32.xlu0 %v52_v3, %s1467_s9  ;;  %v86_v10 = vrot.slane %v1544_v7, %v85_v6  ;;  %v90_v14 = vrot.slane %v1544_v7, %v89_v11  ;;  %v116_v20 = vrot.slane %v1544_v7, %v115_v13  ;;  %v197_v4 = vsub.s32 3, %v1538_v5 }
   0x7   :  { %v120_v27 = vrot.slane %v1544_v7, %v119_v18  ;;  %vm147_vm2 = vcmp.lt.s32.totalorder %v1546_v8, 16  ;;  %vm160_vm3 = vcmp.lt.s32.totalorder %v1546_v8, 112  ;;  %v1800_v8 = vld [vmem:[%s1932_s5 + $0x8] sm:$0xff] }
   0x8   :  { %v1553_v15 = vrot.slane %v86_v10, %v85_v6  ;;  %v1561_v23 = vrot.slane %v90_v14, %v85_v6  ;;  %v1569_v31 = vrot.slane %v116_v20, %v115_v13  ;;  %v201_v6 = vsub.s32 7, %v1538_v5 }
   0x9   :  { %v1574_v37 = vrot.slane %v120_v27, %v115_v13  ;;  %v198_v13 = vrot.slane %v1544_v7, %v197_v4 }
   0xa   :  { %71 = vrot.lane.b32.xlu1 %v52_v3, %s1468_s14  ;;  %69 = vrot.lane.b32.xlu0 %v50_v1, %s1468_s14  ;;  %v172_v3 = vrot.slane %v1544_v7, %v171_v63  ;;  %v202_v14 = vrot.slane %v1544_v7, %v201_v6 }
   0xc   :  { %v1619_v10 = vrot.slane %v172_v3, %v167_v62 }
   0xe   :  { %75 = vrot.lane.b32.xlu1 %v53_v2, %s1468_s14  ;;  %73 = vrot.lane.b32.xlu0 %v51_v0, %s1468_s14  ;;  %v168_v2 = vrot.slane %v1544_v7, %v167_v62 }
  0x74   :  { %v59_v9 = vpop.permute.xlu1 %58  ;;  %v55_v12 = vpop.permute.xlu0 %54 }
  0x75   :  { %v67_v19 = vsel %vm64_vm0, %v59_v9, %v55_v12  ;;  %v65_v28 = vsel %vm64_vm0, %v55_v12, %v59_v9  ;;  %v1617_v9 = vrot.slane %v168_v2, %v167_v62 }
  0x76   :  { %v101_v24 = vmul.f32 %v1553_v15, %v67_v19  ;;  %v102_v35 = vmul.f32 %v1561_v23, %v65_v28 }
  0x78   :  { %v61_v16 = vpop.permute.xlu1 %60  ;;  %v57_v17 = vpop.permute.xlu0 %56  ;;  %v109_v36 = vadd.f32 %v105_v22, %v101_v24  ;;  %v110_v52 = vadd.f32 %v106_v32, %v102_v35 }
  0x79   :  { %v68_v21 = vsel %vm64_vm0, %v61_v16, %v57_v17  ;;  %v66_v33 = vsel %vm64_vm0, %v57_v17, %v61_v16 }
  0x7a   :  { %v103_v30 = vmul.f32 %v1553_v15, %v68_v21  ;;  %v104_v44 = vmul.f32 %v1561_v23, %v66_v33 }
  0x7c   :  { %v72_v25 = vpop.permute.xlu1 %71  ;;  %v70_v26 = vpop.permute.xlu0 %69  ;;  %v111_v45 = vadd.f32 %v107_v29, %v103_v30  ;;  %v112_v53 = vadd.f32 %v108_v34, %v104_v44 }
  0x80   :  { %v76_v38 = vpop.permute.xlu1 %75  ;;  %v74_v39 = vpop.permute.xlu0 %73 }
  0x81   :  { %v79_v40 = vsel %vm77_vm1, %v72_v25, %v76_v38  ;;  %v81_v41 = vsel %vm77_vm1, %v76_v38, %v72_v25  ;;  %v78_v42 = vsel %vm77_vm1, %v70_v26, %v74_v39  ;;  %v80_v43 = vsel %vm77_vm1, %v74_v39, %v70_v26 }
  0x82   :  { %v133_v46 = vmul.f32 %v1569_v31, %v79_v40  ;;  %v131_v47 = vmul.f32 %v1569_v31, %v78_v42  ;;  %v134_v48 = vmul.f32 %v1574_v37, %v81_v41  ;;  %v132_v49 = vmul.f32 %v1574_v37, %v80_v43 }
  0x83   :  { %v1636_v25 = vrot.slane %v198_v13, %v197_v4  ;;  %v1638_v26 = vrot.slane %v202_v14, %v197_v4 }
  0x84   :  { %v137_v50 = vadd.f32 %v133_v46, %v111_v45  ;;  %v135_v51 = vadd.f32 %v131_v47, %v109_v36  ;;  %v138_v54 = vadd.f32 %v134_v48, %v112_v53  ;;  %v136_v55 = vadd.f32 %v132_v49, %v110_v52 }
  0x86   :  { %141 = vrot.lane.b32.xlu1 %v137_v50, %s1469_s1  ;;  %139 = vrot.lane.b32.xlu0 %v135_v51, %s1469_s1  ;;  %v189_v27 = vmul.f32 2.0, %v137_v50  ;;  %v187_v28 = vmul.f32 2.0, %v135_v51  ;;  %v188_v29 = vmul.f32 2.0, %v136_v55  ;;  %v190_v30 = vmul.f32 2.0, %v138_v54 }
  0x8a   :  { %145 = vrot.lane.b32.xlu1 %v138_v54, %s1469_s1  ;;  %143 = vrot.lane.b32.xlu0 %v136_v55, %s1469_s1 }
  0x8e   :  { %154 = vrot.lane.b32.xlu1 %v137_v50, %s1470_s17  ;;  %152 = vrot.lane.b32.xlu0 %v135_v51, %s1470_s17 }
  0x92   :  { %158 = vrot.lane.b32.xlu1 %v138_v54, %s1470_s17  ;;  %156 = vrot.lane.b32.xlu0 %v136_v55, %s1470_s17 }
  0x96   :  { %227 = vperm.xlu0 %1433, %v34_v58   ;;  %232 = vperm.xlu1 %1434, %v35_v59   ;;  %v1655_v58 = vld [vmem:[%s1930_s2] sm:$0xff]  ;;  %v1663_v59 = vld [vmem:[%s1930_s2 + $0x8] sm:$0xff] }
  0x9a   :  { %237 = vperm.xlu1 %1434, %v36_v60   ;;  %242 = vperm.xlu0 %1433, %v37_v61   ;;  %v1671_v60 = vld [vmem:[%s1930_s2 + $0x10] sm:$0xff]  ;;  %v1679_v61 = vld [vmem:[%s1930_s2 + $0x18] sm:$0xff] }
  0xf8   :  { %v142_v0 = vpop.permute.xlu1 %141  ;;  %v140_v1 = vpop.permute.xlu0 %139 }
  0xfc   :  { %v146_v11 = vpop.permute.xlu1 %145  ;;  %v144_v12 = vpop.permute.xlu0 %143 }
  0xfd   :  { %v149_v16 = vsel %vm147_vm2, %v142_v0, %v146_v11  ;;  %v151_v17 = vsel %vm147_vm2, %v146_v11, %v142_v0  ;;  %v148_v5 = vsel %vm147_vm2, %v140_v1, %v144_v12  ;;  %v150_v18 = vsel %vm147_vm2, %v144_v12, %v140_v1 }
  0xfe   :  { %v185_v19 = vmul.f32 %v1617_v9, %v151_v17  ;;  %v186_v20 = vmul.f32 %v1619_v10, %v149_v16  ;;  %v183_v21 = vmul.f32 %v1617_v9, %v150_v18  ;;  %v184_v7 = vmul.f32 %v1619_v10, %v148_v5 }
 0x100   :  { %v155_v22 = vpop.permute.xlu1 %154  ;;  %v153_v24 = vpop.permute.xlu0 %152  ;;  %v193_v32 = vadd.f32 %v189_v27, %v185_v19  ;;  %v191_v33 = vadd.f32 %v187_v28, %v183_v21  ;;  %v192_v36 = vadd.f32 %v188_v29, %v184_v7  ;;  %v194_v38 = vadd.f32 %v190_v30, %v186_v20 }
 0x104   :  { %v159_v34 = vpop.permute.xlu1 %158  ;;  %v157_v35 = vpop.permute.xlu0 %156 }
 0x105   :  { %v162_v39 = vsel %vm160_vm3, %v155_v22, %v159_v34  ;;  %v164_v40 = vsel %vm160_vm3, %v159_v34, %v155_v22  ;;  %v161_v41 = vsel %vm160_vm3, %v153_v24, %v157_v35  ;;  %v163_v42 = vsel %vm160_vm3, %v157_v35, %v153_v24 }
 0x106   :  { %v215_v43 = vmul.f32 %v1636_v25, %v162_v39  ;;  %v216_v44 = vmul.f32 %v1638_v26, %v164_v40  ;;  %v213_v45 = vmul.f32 %v1636_v25, %v161_v41  ;;  %v214_v46 = vmul.f32 %v1638_v26, %v163_v42 }
 0x108   :  { %v218_v47 = vadd.f32 %v214_v46, %v192_v36  ;;  %v220_v48 = vadd.f32 %v216_v44, %v194_v38  ;;  %v217_v49 = vadd.f32 %v213_v45, %v191_v33  ;;  %v219_v50 = vadd.f32 %v215_v43, %v193_v32  ;;  %v1291_v43 = vld [vmem:[%s1927_s0 + $0x30] sm:$0xff]  ;;  %v1289_v44 = vld [vmem:[%s1927_s0 + $0x20] sm:$0xff]  ;;  %v1290_v45 = vld [vmem:[%s1927_s0 + $0x28] sm:$0xff] }
 0x109   :  { %v1292_v46 = vld [vmem:[%s1927_s0 + $0x38] sm:$0xff] }
 0x10a   :  { %v222_v51 = vmul.f32 0.0625, %v218_v47  ;;  %v224_v52 = vmul.f32 0.0625, %v220_v48  ;;  %v221_v53 = vmul.f32 0.0625, %v217_v49  ;;  %v223_v54 = vmul.f32 0.0625, %v219_v50  ;;  %v1717_v47 = vld [vmem:[%s1931_s4] sm:$0xff] }
 0x10b   :  { %1345 = vmatprep.mubr.msk.f32.mxu1 %vm371_vm5, %v1717_v47 }
 0x10c   :  { %v1379_v55 = vpack.c.bf16 %v224_v52, %v222_v51  ;;  %v1381_v57 = vpack.c.bf16 %v223_v54, %v221_v53 }
 0x10e   :  { %1380 = vmatprep.subr.bf16.mxu0 %v1379_v55 }
 0x10f   :  { %1382 = vmatpush1.bf16.msra.mxu0 %v1381_v57 }
 0x112   :  { %1273 = vmatmul.mubr.msk.f32.vlgmr.msra.gmra.mrb[0].mxu0 %vm245_vm4, %v1655_v58 }
 0x113   :  { %328 = vmatprep.mubr.f32.mxu0 %v1471_v56 }
 0x115   :  { %v1684_v62 = vpop.permute.xlu0 %227  ;;  %v1686_v0 = vpop.permute.xlu1 %232 }
 0x116   :  { %1274 = vmatmul.mubr.msk.f32.gmra.mrb[2].mxu0 %vm245_vm4, %v1663_v59 }
 0x117   :  { %334 = vmatprep.mubr.f32.mxu0 %v1471_v56 }
 0x119   :  { %v1692_v16 = vpop.permute.xlu1 %237  ;;  %v1696_v29 = vpop.permute.xlu0 %242 }
 0x11a   :  { %1275 = vmatmul.mubr.msk.f32.gmra.mrb[4].mxu0 %vm245_vm4, %v1671_v60 }
 0x11b   :  { %340 = vmatprep.mubr.f32.mxu0 %v1471_v56 }
 0x11e   :  { %1276 = vmatmul.mubr.msk.f32.gmra.mrb[6].mxu0 %vm245_vm4, %v1679_v61 }
 0x11f   :  { %712 = vmatprep.mubr.f32.mxu0 %v1471_v56 }
 0x1e5   :  { %v324_v63 = vpop.f32.mrb[0].mxu0 }
 0x1e6   :  { %v325_v1 = vadd.f32 %v324_v63, %v1684_v62  ;;  %v326_v2 = vpop.f32.mrb[1].mxu0 }
 0x1e7   :  { %v327_v3 = vadd.f32 %v326_v2, %v1684_v62 }
 0x1e8   :  { %v347_v4 = vmax.f32 %v325_v1, 0.0 }
 0x1e9   :  { %v348_v6 = vmax.f32 %v327_v3, 0.0  ;;  %v330_v11 = vpop.f32.mrb[2].mxu0 }
 0x1ea   :  { %v331_v12 = vadd.f32 %v330_v11, %v1686_v0  ;;  %v332_v13 = vpop.f32.mrb[3].mxu0 }
 0x1eb   :  { %v333_v14 = vadd.f32 %v332_v13, %v1686_v0  ;;  %v355_v17 = vadd.f32 %v348_v6, %v347_v4 }
 0x1ec   :  { %v349_v5 = vmax.f32 %v331_v12, 0.0  ;;  %v764_v12 = vmul.f32 2.0, %v1291_v43 }
 0x1ed   :  { %v350_v18 = vmax.f32 %v333_v14, 0.0  ;;  %v336_v19 = vpop.f32.mrb[4].mxu0  ;;  %356 = vadd.xlane.f32.xlu1 %v355_v17 }
 0x1ee   :  { %v1397_v20 = vpack.c.bf16 %v349_v5, %v347_v4  ;;  %v337_v21 = vadd.f32 %v336_v19, %v1692_v16  ;;  %v338_v7 = vpop.f32.mrb[5].mxu0 }
 0x1ef   :  { %v1395_v22 = vpack.c.bf16 %v350_v18, %v348_v6  ;;  %v339_v24 = vadd.f32 %v338_v7, %v1692_v16  ;;  %v358_v27 = vadd.f32 %v350_v18, %v349_v5  ;;  %v1732_v6 = vld [vmem:[%s1931_s4 + $0x8] sm:$0xff]  ;;  %v765_v18 = vmul.f32 2.0, %v1292_v46 }
 0x1f0   :  { %v351_v28 = vmax.f32 %v337_v21, 0.0  ;;  %v762_v21 = vmul.f32 2.0, %v1289_v44 }
 0x1f1   :  { %v352_v30 = vmax.f32 %v339_v24, 0.0  ;;  %v342_v32 = vpop.f32.mrb[6].mxu0  ;;  %359 = vadd.xlane.f32.xlu0 %v358_v27  ;;  %1396 = vmatprep.subr.bf16.mxu0 %v1395_v22 }
 0x1f2   :  { %v343_v33 = vadd.f32 %v342_v32, %v1696_v29  ;;  %v344_v34 = vpop.f32.mrb[7].mxu0  ;;  %1398 = vmatpush1.bf16.msra.mxu0 %v1397_v20 }
 0x1f3   :  { %v345_v35 = vadd.f32 %v344_v34, %v1696_v29  ;;  %v361_v36 = vadd.f32 %v352_v30, %v351_v28 }
 0x1f4   :  { %v353_v38 = vmax.f32 %v343_v33, 0.0 }
 0x1f5   :  { %v354_v39 = vmax.f32 %v345_v35, 0.0  ;;  %362 = vadd.xlane.f32.xlu0 %v361_v36 }
 0x1f6   :  { %v1401_v40 = vpack.c.bf16 %v353_v38, %v351_v28  ;;  %v763_v28 = vmul.f32 2.0, %v1290_v45 }
 0x1f7   :  { %v1399_v41 = vpack.c.bf16 %v354_v39, %v352_v30  ;;  %v364_v42 = vadd.f32 %v354_v39, %v353_v38 }
 0x1f9   :  { %1400 = vmatprep.subr.bf16.mxu0 %v1399_v41  ;;  %365 = vadd.xlane.f32.xlu1 %v364_v42 }
 0x1fa   :  { %1402 = vmatpush1.bf16.msra.mxu0 %v1401_v40 }
 0x20a   :  { %736 = vrot.lane.b32.xlu1 %v1291_v43, %s1467_s9 }
 0x20b   :  { %734 = vrot.lane.b32.xlu0 %v1289_v44, %s1467_s9 }
 0x20e   :  { %738 = vrot.lane.b32.xlu1 %v1290_v45, %s1467_s9 }
 0x20f   :  { %740 = vrot.lane.b32.xlu0 %v1292_v46, %s1467_s9 }
 0x212   :  { %746 = vrot.lane.b32.xlu1 %v1289_v44, %s1468_s14 }
 0x213   :  { %748 = vrot.lane.b32.xlu0 %v1291_v43, %s1468_s14 }
 0x216   :  { %750 = vrot.lane.b32.xlu1 %v1290_v45, %s1468_s14 }
 0x217   :  { %752 = vrot.lane.b32.xlu0 %v1292_v46, %s1468_s14 }
 0x27a   :  { %v357_v48 = vpop.xlane.xlu1 %356 }
 0x27b   :  { %v367_v50 = vmul.f32 0.00390625, %v357_v48 }
 0x27e   :  { %v360_v49 = vpop.xlane.xlu0 %359 }
 0x27f   :  { %v368_v51 = vmul.f32 0.00390625, %v360_v49 }
 0x281   :  { %v1383_v52 = vpack.c.bf16 %v368_v51, %v367_v50 }
 0x282   :  { %v363_v53 = vpop.xlane.xlu0 %362 }
 0x283   :  { %1384 = vmatprep.subr.bf16.mxu1 %v1383_v52  ;;  %v369_v57 = vmul.f32 0.00390625, %v363_v53 }
 0x284   :  { %1386 = vmatpush3.bf16.msra.mxu1 %v1383_v52 }
 0x286   :  { %v366_v54 = vpop.xlane.xlu1 %365  ;;  %v735_v55 = vpop.permute.xlu0 %734 }
 0x287   :  { %v370_v63 = vmul.f32 0.00390625, %v366_v54 }
 0x289   :  { %v1387_v1 = vpack.c.bf16 %v370_v63, %v369_v57 }
 0x28a   :  { %v737_v2 = vpop.permute.xlu1 %736  ;;  %v741_v3 = vpop.permute.xlu0 %740 }
 0x28b   :  { %1388 = vmatprep.subr.bf16.mxu1 %v1387_v1  ;;  %v745_v4 = vsel %vm64_vm0, %v741_v3, %v737_v2  ;;  %v743_v11 = vsel %vm64_vm0, %v737_v2, %v741_v3 }
 0x28c   :  { %1390 = vmatpush3.bf16.msra.mxu1 %v1387_v1  ;;  %v760_v13 = vmul.f32 %v745_v4, %v1553_v15  ;;  %v761_v19 = vmul.f32 %v743_v11, %v1561_v23 }
 0x28e   :  { %v739_v14 = vpop.permute.xlu1 %738  ;;  %v749_v17 = vpop.permute.xlu0 %748  ;;  %v768_v7 = vadd.f32 %v764_v12, %v760_v13  ;;  %v769_v33 = vadd.f32 %v765_v18, %v761_v19 }
 0x28f   :  { %1346 = vmatmul.mubr.msk.f32.vlgmr.msra.gmra.mrb[0].mxu1 %vm371_vm5, %v1732_v6  ;;  %v744_v5 = vsel %vm64_vm0, %v739_v14, %v735_v55  ;;  %v742_v20 = vsel %vm64_vm0, %v735_v55, %v739_v14 }
 0x290   :  { %v758_v22 = vmul.f32 %v744_v5, %v1553_v15  ;;  %v759_v34 = vmul.f32 %v742_v20, %v1561_v23 }
 0x292   :  { %v747_v24 = vpop.permute.xlu1 %746  ;;  %v753_v27 = vpop.permute.xlu0 %752  ;;  %v766_v38 = vadd.f32 %v762_v21, %v758_v22  ;;  %v767_v42 = vadd.f32 %v763_v28, %v759_v34 }
 0x293   :  { %v755_v30 = vsel %vm77_vm1, %v749_v17, %v753_v27  ;;  %v757_v32 = vsel %vm77_vm1, %v753_v27, %v749_v17 }
 0x294   :  { %v772_v35 = vmul.f32 %v755_v30, %v1569_v31  ;;  %v773_v36 = vmul.f32 %v757_v32, %v1574_v37 }
 0x296   :  { %v751_v39 = vpop.permute.xlu1 %750  ;;  %v776_v40 = vadd.f32 %v772_v35, %v768_v7  ;;  %v777_v23 = vadd.f32 %v773_v36, %v769_v33 }
 0x297   :  { %v754_v15 = vsel %vm77_vm1, %v747_v24, %v751_v39  ;;  %v756_v41 = vsel %vm77_vm1, %v751_v39, %v747_v24 }
 0x298   :  { %v770_v43 = vmul.f32 %v754_v15, %v1569_v31  ;;  %v771_v44 = vmul.f32 %v756_v41, %v1574_v37  ;;  %780 = vrot.lane.b32.xlu0 %v776_v40, %s1469_s1  ;;  %v1769_v31 = vld [vmem:[%s1932_s5] sm:$0xff]  ;;  %v808_v52 = vmul.f32 2.0, %v776_v40  ;;  %v809_v55 = vmul.f32 2.0, %v777_v23 }
 0x299   :  { %1352 = vmatprep.mubr.msk.f32.mxu1 %vm245_vm4, %v1769_v31 }
 0x29a   :  { %v774_v45 = vadd.f32 %v770_v43, %v766_v38  ;;  %v775_v46 = vadd.f32 %v771_v44, %v767_v42 }
 0x29c   :  { %778 = vrot.lane.b32.xlu1 %v774_v45, %s1469_s1  ;;  %784 = vrot.lane.b32.xlu0 %v777_v23, %s1469_s1  ;;  %v807_v3 = vmul.f32 2.0, %v775_v46  ;;  %v806_v4 = vmul.f32 2.0, %v774_v45 }
 0x2a0   :  { %782 = vrot.lane.b32.xlu1 %v775_v46, %s1469_s1  ;;  %792 = vrot.lane.b32.xlu0 %v776_v40, %s1470_s17 }
 0x2a4   :  { %790 = vrot.lane.b32.xlu1 %v774_v45, %s1470_s17  ;;  %796 = vrot.lane.b32.xlu0 %v777_v23, %s1470_s17 }
 0x2a8   :  { %794 = vrot.lane.b32.xlu1 %v775_v46, %s1470_s17 }
 0x30a   :  { %v781_v37 = vpop.permute.xlu0 %780 }
 0x30e   :  { %v779_v48 = vpop.permute.xlu1 %778  ;;  %v785_v49 = vpop.permute.xlu0 %784 }
 0x30f   :  { %v787_v50 = vsel %vm147_vm2, %v781_v37, %v785_v49  ;;  %v789_v51 = vsel %vm147_vm2, %v785_v49, %v781_v37 }
 0x310   :  { %v804_v53 = vmul.f32 %v789_v51, %v1617_v9  ;;  %v805_v54 = vmul.f32 %v787_v50, %v1619_v10 }
 0x312   :  { %v783_v57 = vpop.permute.xlu1 %782  ;;  %v793_v63 = vpop.permute.xlu0 %792  ;;  %v812_v11 = vadd.f32 %v808_v52, %v804_v53  ;;  %v813_v12 = vadd.f32 %v809_v55, %v805_v54 }
 0x313   :  { %v786_v1 = vsel %vm147_vm2, %v779_v48, %v783_v57  ;;  %v788_v2 = vsel %vm147_vm2, %v783_v57, %v779_v48 }
 0x314   :  { %v802_v13 = vmul.f32 %v788_v2, %v1617_v9  ;;  %v803_v14 = vmul.f32 %v786_v1, %v1619_v10 }
 0x316   :  { %v791_v17 = vpop.permute.xlu1 %790  ;;  %v797_v5 = vpop.permute.xlu0 %796  ;;  %v810_v7 = vadd.f32 %v806_v4, %v802_v13  ;;  %v811_v22 = vadd.f32 %v807_v3, %v803_v14 }
 0x317   :  { %v799_v18 = vsel %vm160_vm3, %v793_v63, %v797_v5  ;;  %v801_v19 = vsel %vm160_vm3, %v797_v5, %v793_v63 }
 0x318   :  { %v816_v20 = vmul.f32 %v799_v18, %v1636_v25  ;;  %v817_v21 = vmul.f32 %v801_v19, %v1638_v26 }
 0x31a   :  { %v820_v24 = vadd.f32 %v816_v20, %v812_v11  ;;  %v821_v27 = vadd.f32 %v817_v21, %v813_v12  ;;  %v795_v28 = vpop.permute.xlu1 %794 }
 0x31b   :  { %v798_v9 = vsel %vm160_vm3, %v791_v17, %v795_v28  ;;  %v800_v10 = vsel %vm160_vm3, %v795_v28, %v791_v17 }
 0x31c   :  { %v814_v30 = vmul.f32 %v798_v9, %v1636_v25  ;;  %v815_v32 = vmul.f32 %v800_v10, %v1638_v26  ;;  %v824_v33 = vmul.f32 0.0625, %v820_v24  ;;  %v825_v34 = vmul.f32 0.0625, %v821_v27  ;;  %v1805_v25 = vld [vmem:[%s1932_s5 + $0x10] sm:$0xff]  ;;  %v1814_v26 = vld [vmem:[%s1932_s5 + $0x18] sm:$0xff] }
 0x31e   :  { %v818_v35 = vadd.f32 %v814_v30, %v810_v7  ;;  %v819_v36 = vadd.f32 %v815_v32, %v811_v22 }
 0x320   :  { %v822_v38 = vmul.f32 0.0625, %v818_v35  ;;  %v823_v39 = vmul.f32 0.0625, %v819_v36 }
 0x322   :  { %v1405_v40 = vpack.c.bf16 %v824_v33, %v822_v38  ;;  %v1403_v15 = vpack.c.bf16 %v825_v34, %v823_v39 }
 0x362   :  { %v1347_v41 = vpop.f32.mrb[0].mxu1 }
 0x363   :  { %v454_v42 = vmax.f32 %v1347_v41, 0.0  ;;  %v444_v43 = vpop.f32.mrb[1].mxu1 }
 0x364   :  { %v453_v44 = vmax.f32 %v444_v43, 0.0 }
 0x366   :  { %v1391_v23 = vpack.c.bf16 %v454_v42, %v453_v44  ;;  %v1848_v44 = vld [vmem:[%s1933_s6 + $0x8] sm:$0xff] }
 0x368   :  { %1392 = vmatprep.subr.bf16.mxu1 %v1391_v23 }
 0x369   :  { %1394 = vmatpush3.bf16.msra.mxu1 %v1391_v23 }
 0x36a   :  { %1404 = vmatprep.subr.bf16.mxu1 %v1403_v15 }
 0x36c   :  { %1353 = vmatmul.mubr.msk.f32.vlgmr.msra.gmra.mrb[2].mxu1 %vm245_vm4, %v1800_v8 }
 0x36d   :  { %1406 = vmatpush1.bf16.msra.mxu1 %v1405_v40  ;;  %1355 = vmatprep.mubr.msk.f32.mxu1 %vm245_vm4, %v1805_v25 }
 0x370   :  { %1356 = vmatmul.mubr.msk.f32.gmra.mrb[4].mxu1 %vm245_vm4, %v1814_v26 }
 0x371   :  { %890 = vmatprep.mubr.f32.mxu1 %v1471_v56 }
 0x374   :  { %1293 = vmatmul.mubr.msk.f32.vlgmr.msra.gmra.mrb[6].mxu1 %vm245_vm4, %v1655_v58 }
 0x375   :  { %896 = vmatprep.mubr.f32.mxu1 %v1471_v56 }
 0x378   :  { %1294 = vmatmul.mubr.msk.f32.gmra.mrb[8].mxu1 %vm245_vm4, %v1663_v59 }
 0x379   :  { %902 = vmatprep.mubr.f32.mxu1 %v1471_v56 }
 0x37c   :  { %1295 = vmatmul.mubr.msk.f32.gmra.mrb[10].mxu1 %vm245_vm4, %v1671_v60 }
 0x37d   :  { %908 = vmatprep.mubr.f32.mxu1 %v1471_v56 }
 0x380   :  { %1296 = vmatmul.mubr.msk.f32.gmra.mrb[12].mxu1 %vm245_vm4, %v1679_v61 }
 0x381   :  { %1251 = vmatprep.mubr.f32.mxu1 %v1471_v56 }
 0x43f   :  { %v1354_v45 = vpop.f32.mrb[2].mxu1 }
 0x440   :  { %v1284_v46 = vmul.f32 -1.442695, %v1354_v45  ;;  %v533_v58 = vpop.f32.mrb[3].mxu1 }
 0x441   :  { %v1283_v37 = vmul.f32 -1.442695, %v533_v58 }
 0x442   :  { %1435 = vpow2.f32 %v1284_v46  ;;  %v1854_v46 = vld [vmem:[%s1933_s6 + $0x10] sm:$0xff] }
 0x443   :  { %1437 = vpow2.f32 %v1283_v37  ;;  %v1357_v48 = vpop.f32.mrb[4].mxu1 }
 0x444   :  { %v1286_v59 = vmul.f32 -1.442695, %v1357_v48  ;;  %v543_v49 = vpop.f32.mrb[5].mxu1  ;;  %v1860_v48 = vld [vmem:[%s1933_s6 + $0x18] sm:$0xff] }
 0x445   :  { %v1285_v50 = vmul.f32 -1.442695, %v543_v49 }
 0x446   :  { %1439 = vpow2.f32 %v1286_v59 }
 0x447   :  { %1441 = vpow2.f32 %v1285_v50  ;;  %v892_v60 = vpop.f32.mrb[6].mxu1 }
 0x448   :  { %v893_v51 = vadd.f32 %v892_v60, %v1684_v62  ;;  %v894_v52 = vpop.f32.mrb[7].mxu1  ;;  %v48_v60 = vld [vmem:[%s1934_s7] sm:$0xff] }
 0x449   :  { %v895_v61 = vadd.f32 %v894_v52, %v1684_v62 }
 0x44a   :  { %v915_v53 = vmax.f32 %v893_v51, 0.0 }
 0x44b   :  { %v916_v54 = vmax.f32 %v895_v61, 0.0  ;;  %v898_v55 = vpop.f32.mrb[8].mxu1 }
 0x44c   :  { %v1436_v57 = vpop.eup %1435  ;;  %v899_v63 = vadd.f32 %v898_v55, %v1686_v0  ;;  %v900_v1 = vpop.f32.mrb[9].mxu1 }
 0x44d   :  { %v1438_v2 = vpop.eup %1437  ;;  %v565_v3 = vadd.f32 1.0, %v1436_v57  ;;  %v901_v4 = vadd.f32 %v900_v1, %v1686_v0  ;;  %v923_v11 = vadd.f32 %v916_v54, %v915_v53 }
 0x44e   :  { %v564_v12 = vadd.f32 1.0, %v1438_v2  ;;  %v917_v13 = vmax.f32 %v899_v63, 0.0 }
 0x44f   :  { %1443 = vrcp.f32 %v565_v3  ;;  %v918_v14 = vmax.f32 %v901_v4, 0.0  ;;  %v904_v17 = vpop.f32.mrb[10].mxu1 }
 0x450   :  { %v1440_v5 = vpop.eup %1439  ;;  %1445 = vrcp.f32 %v564_v12  ;;  %v1421_v62 = vpack.c.bf16 %v917_v13, %v915_v53  ;;  %v905_v18 = vadd.f32 %v904_v17, %v1692_v16  ;;  %v906_v19 = vpop.f32.mrb[11].mxu1 }
 0x451   :  { %v1442_v20 = vpop.eup %1441  ;;  %v567_v21 = vadd.f32 1.0, %v1440_v5  ;;  %v1419_v7 = vpack.c.bf16 %v918_v14, %v916_v54  ;;  %v907_v22 = vadd.f32 %v906_v19, %v1692_v16  ;;  %v926_v24 = vadd.f32 %v918_v14, %v917_v13 }
 0x452   :  { %v566_v27 = vadd.f32 1.0, %v1442_v20  ;;  %v919_v0 = vmax.f32 %v905_v18, 0.0 }
 0x453   :  { %1447 = vrcp.f32 %v567_v21  ;;  %v920_v28 = vmax.f32 %v907_v22, 0.0  ;;  %v910_v9 = vpop.f32.mrb[12].mxu1  ;;  %1420 = vmatprep.subr.bf16.mxu1 %v1419_v7 }
 0x454   :  { %1449 = vrcp.f32 %v566_v27  ;;  %v911_v10 = vadd.f32 %v910_v9, %v1696_v29  ;;  %v912_v30 = vpop.f32.mrb[13].mxu1  ;;  %1422 = vmatpush1.bf16.msra.mxu1 %v1421_v62 }
 0x455   :  { %v913_v32 = vadd.f32 %v912_v30, %v1696_v29  ;;  %v929_v33 = vadd.f32 %v920_v28, %v919_v0  ;;  %v1842_v29 = vld [vmem:[%s1933_s6] sm:$0xff] }
 0x456   :  { %v921_v34 = vmax.f32 %v911_v10, 0.0 }
 0x457   :  { %v922_v35 = vmax.f32 %v913_v32, 0.0 }
 0x458   :  { %v1425_v36 = vpack.c.bf16 %v921_v34, %v919_v0 }
 0x459   :  { %v1444_v38 = vpop.eup %1443  ;;  %v1423_v16 = vpack.c.bf16 %v922_v35, %v920_v28  ;;  %v932_v39 = vadd.f32 %v922_v35, %v921_v34 }
 0x45a   :  { %v1446_v40 = vpop.eup %1445  ;;  %583 = vperm.xlu0 %1433, %v1444_v38  }
 0x45b   :  { %578 = vperm.xlu1 %1434, %v1446_v40   ;;  %1424 = vmatprep.subr.bf16.mxu1 %v1423_v16 }
 0x45c   :  { %1426 = vmatpush1.bf16.msra.mxu1 %v1425_v36 }
 0x45d   :  { %v1448_v15 = vpop.eup %1447 }
 0x45e   :  { %v1450_v41 = vpop.eup %1449  ;;  %593 = vperm.xlu0 %1433, %v1448_v15  }
 0x45f   :  { %588 = vperm.xlu1 %1434, %v1450_v41  }
 0x47d   :  { %927 = vadd.xlane.f32.xlu0 %v926_v24 }
 0x481   :  { %930 = vadd.xlane.f32.xlu0 %v929_v33 }
 0x483   :  { %924 = vadd.xlane.f32.xlu1 %v923_v11 }
 0x487   :  { %933 = vadd.xlane.f32.xlu1 %v932_v39 }
 0x4d9   :  { %v584_v23 = vpop.permute.xlu0 %583 }
 0x4da   :  { %v579_v42 = vpop.permute.xlu1 %578  ;;  %v597_v45 = vmul.f32 %v584_v23, %v1848_v44  ;;  %v49_v23 = vld [vmem:[%s1934_s7 + $0x8] sm:$0xff] }
 0x4db   :  { %v596_v43 = vmul.f32 %v579_v42, %v1842_v29 }
 0x4dd   :  { %610 = vxpose.xlu0.b32.start [1/4] (short) (narrow) %v596_v43, 16  ;;  %v594_v59 = vpop.permute.xlu0 %593 }
 0x4de   :  { %v589_v58 = vpop.permute.xlu1 %588  ;;  %v599_v49 = vmul.f32 %v594_v59, %v1860_v48 }
 0x4df   :  { %v598_v37 = vmul.f32 %v589_v58, %v1854_v46 }
 0x4e1   :  { %611 = vxpose.xlu0.b32.cont [2/4] (short) (narrow) %v597_v45, 16 }
 0x4e5   :  { %612 = vxpose.xlu0.b32.cont [3/4] (short) (narrow) %v598_v37, 16 }
 0x4e9   :  { %613 = vxpose.xlu0.b32.end [4/4] (short) (narrow) %v599_v49, 16 }
 0x50a   :  { %v928_v50 = vpop.xlane.xlu0 %927 }
 0x50b   :  { %v936_v52 = vmul.f32 0.00390625, %v928_v50 }
 0x50e   :  { %v931_v55 = vpop.xlane.xlu0 %930 }
 0x50f   :  { %v937_v63 = vmul.f32 0.00390625, %v931_v55 }
 0x510   :  { %v925_v51 = vpop.xlane.xlu1 %924 }
 0x511   :  { %v935_v61 = vmul.f32 0.00390625, %v925_v51 }
 0x512   :  { %602 = vperm.xlu0 %1433, %v48_v60  }
 0x513   :  { %v1407_v53 = vpack.c.bf16 %v936_v52, %v935_v61 }
 0x514   :  { %v934_v54 = vpop.xlane.xlu1 %933 }
 0x515   :  { %1408 = vmatprep.subr.bf16.mxu0 %v1407_v53  ;;  %v938_v57 = vmul.f32 0.00390625, %v934_v54 }
 0x517   :  { %v1411_v2 = vpack.c.bf16 %v938_v57, %v937_v63 }
 0x55d   :  { %v626_v1 = vpop.trf.xlu0 }
 0x55e   :  { %1287 = vmatmul.mubr.msk.f32.vlgmr.msra.gmra.mrb[8].mxu0 %vm371_vm5, %v626_v1 }
 0x55f   :  { %1410 = vmatpush3.bf16.msra.mxu0 %v1407_v53  ;;  %718 = vmatprep.mubr.f32.mxu0 %v1471_v56 }
 0x560   :  { %1412 = vmatprep.subr.bf16.mxu0 %v1411_v2 }
 0x561   :  { %v627_v3 = vpop.trf.xlu0 }
 0x562   :  { %1288 = vmatmul.mubr.msk.f32.gmra.mrb[10].mxu0 %vm371_vm5, %v627_v3 }
 0x563   :  { %1414 = vmatpush3.bf16.msra.mxu0 %v1411_v2  ;;  %1366 = vmatprep.mubr.msk.f32.mxu0 %vm371_vm5, %v1717_v47 }
 0x566   :  { %1367 = vmatmul.mubr.msk.f32.vlgmr.msra.gmra.mrb[12].mxu0 %vm371_vm5, %v1732_v6 }
 0x567   :  { %1373 = vmatprep.mubr.msk.f32.mxu0 %vm245_vm4, %v1769_v31 }
 0x591   :  { %v1875_v4 = vpop.permute.xlu0 %602 }
 0x631   :  { %v714_v11 = vpop.f32.mrb[8].mxu0 }
 0x632   :  { %v715_v12 = vadd.f32 %v714_v11, %v1875_v4  ;;  %v716_v13 = vpop.f32.mrb[9].mxu0 }
 0x633   :  { %v717_v14 = vadd.f32 %v716_v13, %v1875_v4 }
 0x634   :  { %725 = vst [vmem:[%s1935_s8] sm:$0xff] %v715_v12 }
 0x635   :  { %726 = vst [vmem:[%s1935_s8 + $0x8] sm:$0xff] %v717_v14  ;;  %v1885_v47 = vpop.f32.mrb[10].mxu0 }
 0x636   :  { %v1887_v6 = vpop.f32.mrb[11].mxu0 }
 0x639   :  { %v1368_v31 = vpop.f32.mrb[12].mxu0 }
 0x63a   :  { %v1015_v17 = vmax.f32 %v1368_v31, 0.0  ;;  %v1005_v5 = vpop.f32.mrb[13].mxu0 }
 0x63b   :  { %v1014_v62 = vmax.f32 %v1005_v5, 0.0 }
 0x63d   :  { %v1415_v18 = vpack.c.bf16 %v1015_v17, %v1014_v62 }
 0x63f   :  { %1416 = vmatprep.subr.bf16.mxu0 %v1415_v18 }
 0x640   :  { %1418 = vmatpush3.bf16.msra.mxu0 %v1415_v18 }
 0x643   :  { %1374 = vmatmul.mubr.msk.f32.vlgmr.msra.gmra.mrb[14].mxu0 %vm245_vm4, %v1800_v8 }
 0x644   :  { %1376 = vmatprep.mubr.msk.f32.mxu0 %vm245_vm4, %v1805_v25 }
 0x647   :  { %1377 = vmatmul.mubr.msk.f32.gmra.mrb[16].mxu0 %vm245_vm4, %v1814_v26 }
 0x716   :  { %v1375_v19 = vpop.f32.mrb[14].mxu0 }
 0x717   :  { %v1304_v20 = vmul.f32 -1.442695, %v1375_v19  ;;  %v1082_v21 = vpop.f32.mrb[15].mxu0 }
 0x718   :  { %v1303_v7 = vmul.f32 -1.442695, %v1082_v21 }
 0x719   :  { %1451 = vpow2.f32 %v1304_v20 }
 0x71a   :  { %1453 = vpow2.f32 %v1303_v7  ;;  %v1378_v22 = vpop.f32.mrb[16].mxu0 }
 0x71b   :  { %v1306_v24 = vmul.f32 -1.442695, %v1378_v22  ;;  %v1092_v27 = vpop.f32.mrb[17].mxu0 }
 0x71c   :  { %v1305_v0 = vmul.f32 -1.442695, %v1092_v27 }
 0x71e   :  { %1455 = vpow2.f32 %v1305_v0 }
 0x71f   :  { %1457 = vpow2.f32 %v1306_v24 }
 0x723   :  { %v1452_v28 = vpop.eup %1451 }
 0x724   :  { %v1454_v8 = vpop.eup %1453  ;;  %v1114_v9 = vadd.f32 1.0, %v1452_v28 }
 0x725   :  { %v1113_v25 = vadd.f32 1.0, %v1454_v8 }
 0x726   :  { %1459 = vrcp.f32 %v1114_v9 }
 0x727   :  { %1461 = vrcp.f32 %v1113_v25 }
 0x728   :  { %v1456_v10 = vpop.eup %1455 }
 0x729   :  { %v1458_v30 = vpop.eup %1457  ;;  %v1115_v26 = vadd.f32 1.0, %v1456_v10 }
 0x72a   :  { %v1116_v32 = vadd.f32 1.0, %v1458_v30 }
 0x72b   :  { %1463 = vrcp.f32 %v1115_v26 }
 0x72c   :  { %1465 = vrcp.f32 %v1116_v32 }
 0x730   :  { %v1460_v33 = vpop.eup %1459 }
 0x731   :  { %1132 = vperm.xlu1 %1434, %v1460_v33   ;;  %v1462_v34 = vpop.eup %1461 }
 0x735   :  { %1127 = vperm.xlu1 %1434, %v1462_v34   ;;  %v1464_v35 = vpop.eup %1463 }
 0x736   :  { %v1466_v36 = vpop.eup %1465 }
 0x739   :  { %1137 = vperm.xlu1 %1434, %v1464_v35  }
 0x73d   :  { %1142 = vperm.xlu1 %1434, %v1466_v36  }
 0x7b0   :  { %v1133_v38 = vpop.permute.xlu1 %1132 }
 0x7b1   :  { %v1146_v15 = vmul.f32 %v1133_v38, %v1848_v44 }
 0x7b4   :  { %v1128_v16 = vpop.permute.xlu1 %1127 }
 0x7b5   :  { %v1145_v39 = vmul.f32 %v1128_v16, %v1842_v29 }
 0x7b7   :  { %1149 = vxpose.xlu1.b32.start [1/4] (short) (narrow) %v1145_v39, 16 }
 0x7b8   :  { %v1138_v40 = vpop.permute.xlu1 %1137 }
 0x7b9   :  { %v1147_v41 = vmul.f32 %v1138_v40, %v1854_v46 }
 0x7bb   :  { %1150 = vxpose.xlu1.b32.cont [2/4] (short) (narrow) %v1146_v15, 16 }
 0x7bc   :  { %v1143_v42 = vpop.permute.xlu1 %1142 }
 0x7bd   :  { %v1148_v43 = vmul.f32 %v1143_v42, %v1860_v48 }
 0x7bf   :  { %1151 = vxpose.xlu1.b32.cont [3/4] (short) (narrow) %v1147_v41, 16 }
 0x7c3   :  { %1152 = vxpose.xlu1.b32.end [4/4] (short) (narrow) %v1148_v43, 16 }
 0x7e1   :  { %607 = vperm.xlu1 %1434, %v49_v23  }
 0x837   :  { %v1165_v45 = vpop.trf.xlu1 }
 0x838   :  { %1307 = vmatmul.mubr.msk.f32.vlgmr.msra.gmra.mrb[14].mxu1 %vm371_vm5, %v1165_v45 }
 0x839   :  { %1257 = vmatprep.mubr.f32.mxu1 %v1471_v56 }
 0x83b   :  { %v1166_v29 = vpop.trf.xlu1 }
 0x83c   :  { %1308 = vmatmul.mubr.msk.f32.gmra.mrb[16].mxu1 %vm371_vm5, %v1166_v29 }
 0x860   :  { %v608_v44 = vpop.permute.xlu1 %607 }
 0x861   :  { %v721_v46 = vadd.f32 %v1885_v47, %v608_v44  ;;  %v723_v58 = vadd.f32 %v1887_v6, %v608_v44 }
 0x863   :  { %727 = vst [vmem:[%s1935_s8 + $0x10] sm:$0xff] %v721_v46  ;;  %728 = vst [vmem:[%s1935_s8 + $0x18] sm:$0xff] %v723_v58 }
 0x90b   :  { %v1253_v37 = vpop.f32.mrb[14].mxu1 }
 0x90c   :  { %v1254_v48 = vadd.f32 %v1253_v37, %v1875_v4  ;;  %v1255_v56 = vpop.f32.mrb[15].mxu1 }
 0x90d   :  { %v1256_v59 = vadd.f32 %v1255_v56, %v1875_v4 }
 0x90e   :  { %1309 = vst [vmem:[%s1935_s8 + $0x20] sm:$0xff] %v1254_v48 }
 0x90f   :  { %1310 = vst [vmem:[%s1935_s8 + $0x28] sm:$0xff] %v1256_v59  ;;  %v1259_v49 = vpop.f32.mrb[16].mxu1 }
 0x910   :  { %v1260_v50 = vadd.f32 %v1259_v49, %v608_v44  ;;  %v1261_v60 = vpop.f32.mrb[17].mxu1 }
 0x911   :  { %v1262_v51 = vadd.f32 %v1261_v60, %v608_v44 }
 0x912   :  { %1311 = vst [vmem:[%s1935_s8 + $0x30] sm:$0xff] %v1260_v50 }
 0x913   :  { %1312 = vst [vmem:[%s1935_s8 + $0x38] sm:$0xff] %v1262_v51 }

</bundles_post_ra>
